<compile_context>
chip_gen: v7x
topology: tpu7x:2x2x1
jax: 0.10.0
libtpu: 0.0.40
codegen_flags: <defaults>
</compile_context>

<pallas_src>
import functools

import jax
import jax.numpy as jnp
from jax.experimental import pallas as pl
from jax.experimental.pallas import tpu as pltpu


def _round_up(x, m):
    return (x + m - 1) // m * m


def textcnn_kernel(x_ref, w_ref, b_ref, mask_ref, fcw_ref, fcb_ref, out_ref,
                   *, n_shifts, p_out):
    """One grid step: conv-as-matmul + bias + ReLU + mask + max-pool + fc
    for TB batch rows.

    x_ref:    (rows, TB, K_eff) bf16 activations, rows == p_out + n_shifts - 1.
    w_ref:    (n_shifts, K_eff, Fp) bf16 merged conv weights.
    b_ref:    (1, Fp) f32 merged conv bias.
    mask_ref: (p_out, 1, Fp) f32 validity mask (per filter-size group).
    fcw_ref:  (Fp, Cp) bf16;  fcb_ref: (1, Cp) f32.
    out_ref:  (TB, Cp) f32, lane-dense.
    """
    x = x_ref[...]                               # (rows, TB, K_eff) bf16
    rows, tb, k_eff = x.shape
    f_pad = w_ref.shape[-1]

    # Collapse (rows, TB) onto sublanes; shift j is the sublane-aligned slice
    # [j*TB, (j+p_out)*TB) since TB is a multiple of 16 (bf16 packing).
    x2 = x.reshape(rows * tb, k_eff)

    # n_shifts == 1 on the im2col path: a single bf16 MXU matmul, K = k_max*E.
    acc = jnp.dot(x2[0:p_out * tb, :], w_ref[0],
                  preferred_element_type=jnp.float32)         # (p_out*TB, Fp)
    for j in range(1, n_shifts):                 # static; unrolled
        acc = acc + jnp.dot(x2[j * tb:(j + p_out) * tb, :], w_ref[j],
                            preferred_element_type=jnp.float32)

    # Elementwise epilogue in f32 (no bf16 VPU on v5e).
    acc = jnp.maximum(acc + b_ref[...], 0.0)                  # bias + ReLU
    acc = acc.reshape(p_out, tb, f_pad) * mask_ref[...]       # zero invalid pos
    pooled = jnp.max(acc, axis=0)                             # (TB, Fp) f32

    logits = jnp.dot(pooled.astype(fcw_ref.dtype), fcw_ref[...],
                     preferred_element_type=jnp.float32) + fcb_ref[...]
    out_ref[...] = logits.astype(out_ref.dtype)               # (TB, Cp) lane-dense


def textcnn_forward(tokens, params, *, block_b=None, act_vmem_budget=20 << 20):
    """tokens: (B, L) int32. Returns (B, num_classes) float32."""
    emb_table = params["embedding"]                           # (V, E)
    B, L = tokens.shape
    E = emb_table.shape[1]
    ks = [params[f"w{i}"].shape[0] for i in range(3)]
    F = params["w0"].shape[2]
    C = params["fc_b"].shape[-1]
    k_max, k_min = max(ks), min(ks)
    if L < k_max:
        raise ValueError(f"seq_len={L} must be >= max kernel size {k_max}")

    p_out = L - k_min + 1                     # longest conv output length
    l_pad = L + (k_max - k_min)               # rows touched by all shifts
    f_pad = _round_up(3 * F, 128)             # lane-dense filter dim
    c_pad = _round_up(C, 128)                 # lane-dense output dim

    # Small-E configs (demo E=32): fold k into the contraction (im2col) so the
    # conv is one lane-dense matmul. Large E keeps the compact staging.
    use_im2col = E < 128
    n_shifts = 1 if use_im2col else k_max
    k_eff = k_max * E if use_im2col else E
    rows = p_out if use_im2col else l_pad

    # ---- choose TB from a VMEM budget; force >= 2 grid steps ----------------
    if block_b is None:
        row_bytes = rows * k_eff * 2                         # bf16 per batch row
        cap = max(16, (act_vmem_budget // (2 * row_bytes)) // 16 * 16)
        block_b = min(128, cap, _round_up(B, 16))
        if -(-B // block_b) < 2:                             # keep >= 2 steps
            block_b = max(16, _round_up(-(-B // 2), 16))
        block_b = min(block_b, cap)
    assert block_b % 16 == 0, "TB must be a multiple of 16 for bf16 sublanes"
    n_blocks = max(2, -(-B // block_b))
    b_pad = n_blocks * block_b

    # ---- pack / pad parameters into lane-dense merged layouts ---------------
    w_cat = jnp.zeros((k_max, E, f_pad), jnp.float32)
    b_cat = jnp.zeros((1, f_pad), jnp.float32)
    mask = jnp.zeros((p_out, 1, f_pad), jnp.float32)
    pos = jnp.arange(p_out, dtype=jnp.int32)[:, None, None]
    for i, k in enumerate(ks):
        w_cat = w_cat.at[:k, :, i * F:(i + 1) * F].set(params[f"w{i}"])
        b_cat = b_cat.at[:, i * F:(i + 1) * F].set(params[f"b{i}"])
        valid = (pos < (L - k + 1)).astype(jnp.float32)      # (p_out,1,1)
        mask = mask.at[:, :, i * F:(i + 1) * F].set(
            jnp.broadcast_to(valid, (p_out, 1, F)))
    if use_im2col:
        w_pack = w_cat.reshape(1, k_max * E, f_pad).astype(jnp.bfloat16)
    else:
        w_pack = w_cat.astype(jnp.bfloat16)
    fcw = jnp.zeros((f_pad, c_pad), jnp.float32).at[:3 * F, :C].set(
        params["fc_w"]).astype(jnp.bfloat16)
    fcb = jnp.zeros((1, c_pad), jnp.float32).at[:, :C].set(params["fc_b"])

    # ---- embedding gather, staged in bf16, (L, B, E) layout -----------------
    tok = jnp.pad(tokens, ((0, b_pad - B), (0, 0)))          # pad batch (id 0)
    emb = jnp.take(emb_table, tok.T, axis=0).astype(jnp.bfloat16)  # (L,Bp,E)
    emb = jnp.pad(emb, ((0, l_pad - L), (0, 0), (0, 0)))     # (L_pad, Bp, E)
    if use_im2col:
        x = jnp.stack([emb[j:j + p_out] for j in range(k_max)], axis=-2)
        x = x.reshape(p_out, b_pad, k_max * E)               # (p_out, Bp, k*E)
    else:
        x = emb                                              # (L_pad, Bp, E)

    # ---- explicit VMEM budget for the chosen TB -----------------------------
    weights_bytes = sum(int(a.size) * a.dtype.itemsize
                        for a in (w_pack, b_cat, mask, fcw, fcb))
    act_block_bytes = rows * block_b * k_eff * 2
    out_block_bytes = block_b * c_pad * 4
    acc_bytes = p_out * block_b * f_pad * 4
    need = 2 * (act_block_bytes + out_block_bytes + weights_bytes) + 2 * acc_bytes
    vmem_limit = int(min(64 << 20, max(16 << 20, need + (4 << 20))))

    full = lambda a: pl.BlockSpec(a.shape, lambda b: (0,) * a.ndim)
    kernel = functools.partial(textcnn_kernel, n_shifts=n_shifts, p_out=p_out)

    out = pl.pallas_call(
        kernel,
        out_shape=jax.ShapeDtypeStruct((b_pad, c_pad), jnp.float32),
        grid_spec=pltpu.PrefetchScalarGridSpec(
            num_scalar_prefetch=0,
            grid=(n_blocks,),
            in_specs=[
                pl.BlockSpec((rows, block_b, k_eff), lambda b: (0, b, 0)),
                full(w_pack), full(b_cat), full(mask), full(fcw), full(fcb),
            ],
            out_specs=pl.BlockSpec((block_b, c_pad), lambda b: (b, 0)),
        ),
        compiler_params=pltpu.CompilerParams(
            dimension_semantics=("parallel",),
            vmem_limit_bytes=vmem_limit),
    )(x, w_pack, b_cat, mask, fcw, fcb)
    return out[:B, :C]


def init_params(key, vocab_size, embedding_dim, num_filters,
                kernel_sizes, num_classes):
    keys = jax.random.split(key, 9)
    emb = 0.02 * jax.random.normal(keys[0], (vocab_size, embedding_dim),
                                   jnp.float32)
    emb = emb.at[0].set(0.0)                  # padding_idx=0 -> zero row

    params = {"embedding": emb}
    for i, k in enumerate(kernel_sizes):
        # PyTorch Conv2d weight is (F, 1, k, E); store as (k, E, F) for matmul.
        w = 0.1 * jax.random.normal(keys[1 + 2 * i],
                                    (k, embedding_dim, num_filters),
                                    jnp.float32)
        b = 0.1 * jax.random.normal(keys[2 + 2 * i], (1, num_filters),
                                    jnp.float32)
        params[f"w{i}"] = w
        params[f"b{i}"] = b

    # PyTorch Linear weight is (C, 3F); store transposed as (3F, C).
    params["fc_w"] = 0.1 * jax.random.normal(
        keys[7], (num_filters * 3, num_classes), jnp.float32)
    params["fc_b"] = 0.1 * jax.random.normal(
        keys[8], (1, num_classes), jnp.float32)
    return params


if __name__ == "__main__":
    # Small config consistent with the module's __init__.
    vocab_size = 50
    embedding_dim = 32
    num_filters = 8
    filter_w, filter_h, filter_d = 2, 3, 4
    num_classes = 4
    batch, seq_len = 2, 16

    key = jax.random.PRNGKey(0)
    pkey, tkey = jax.random.split(key)
    params = init_params(pkey, vocab_size, embedding_dim, num_filters,
                         (filter_w, filter_h, filter_d), num_classes)

    tokens = jax.random.randint(tkey, (batch, seq_len), 0, vocab_size,
                                dtype=jnp.int32)

    out = textcnn_forward(tokens, params)
    jax.block_until_ready(out)

    # Reference check in plain JAX f32 (same math as the PyTorch module, eval).
    emb = jnp.take(params["embedding"], tokens, axis=0)      # (B, L, E)
    feats = []
    for i, k in enumerate((filter_w, filter_h, filter_d)):
        w, b = params[f"w{i}"], params[f"b{i}"]
        l_out = seq_len - k + 1
        acc = sum(jnp.einsum("ble,ef->blf", emb[:, j:j + l_out, :], w[j])
                  for j in range(k)) + b[None]
        feats.append(jnp.max(jnp.maximum(acc, 0.0), axis=1))
    ref = jnp.concatenate(feats, axis=1) @ params["fc_w"] + params["fc_b"]

    assert out.shape == (batch, num_classes)
    # bf16 MXU operands (f32 accumulation) -> loosened tolerance vs f32 ref.
    assert jnp.allclose(out, ref, atol=2e-2, rtol=2e-2), (out, ref)
    print("KERNEL_OK")
</pallas_src>

<mosaic_0001>
module attributes {stable_mosaic.version = 11 : i64} {
  func.func @textcnn_kernel(%arg0: i32, %arg1: memref<15x16x128xbf16, #tpu.memory_space<vmem>>, %arg2: memref<1x128x128xbf16, #tpu.memory_space<vmem>>, %arg3: memref<1x128xf32, #tpu.memory_space<vmem>>, %arg4: memref<15x1x128xf32, #tpu.memory_space<vmem>>, %arg5: memref<128x128xbf16, #tpu.memory_space<vmem>>, %arg6: memref<1x128xf32, #tpu.memory_space<vmem>>, %arg7: memref<16x128xf32, #tpu.memory_space<vmem>>) attributes {dimension_semantics = [#tpu.dimension_semantics<parallel>], iteration_bounds = array<i64: 2>, scalar_prefetch = 0 : i64, scratch_operands = 0 : i64, tpu.core_type = #tpu.core_type<tc>, window_params = [{transform_indices = @transform_0, window_bounds = array<i64: 15, 16, 128>}, {pipeline_mode = #tpu.pipeline_mode<synchronous>, transform_indices = @transform_1, window_bounds = array<i64: 1, 128, 128>}, {pipeline_mode = #tpu.pipeline_mode<synchronous>, transform_indices = @transform_2, window_bounds = array<i64: 1, 128>}, {pipeline_mode = #tpu.pipeline_mode<synchronous>, transform_indices = @transform_3, window_bounds = array<i64: 15, 1, 128>}, {pipeline_mode = #tpu.pipeline_mode<synchronous>, transform_indices = @transform_4, window_bounds = array<i64: 128, 128>}, {pipeline_mode = #tpu.pipeline_mode<synchronous>, transform_indices = @transform_5, window_bounds = array<i64: 1, 128>}, {transform_indices = @transform_6, window_bounds = array<i64: 16, 128>}]} {
    %c0 = arith.constant 0 : index
    %c0_0 = arith.constant 0 : index
    %c0_1 = arith.constant 0 : index
    %0 = vector.load %arg1[%c0, %c0_0, %c0_1] : memref<15x16x128xbf16, #tpu.memory_space<vmem>>, vector<15x16x128xbf16>
    %1 = vector.shape_cast %0 : vector<15x16x128xbf16> to vector<240x128xbf16>
    %c0_2 = arith.constant 0 : index
    %c0_3 = arith.constant 0 : index
    %c0_4 = arith.constant 0 : index
    %2 = vector.load %arg2[%c0_2, %c0_3, %c0_4] : memref<1x128x128xbf16, #tpu.memory_space<vmem>>, vector<1x128x128xbf16>
    %3 = vector.shape_cast %2 : vector<1x128x128xbf16> to vector<128x128xbf16>
    %cst = arith.constant dense<0.000000e+00> : vector<240x128xf32>
    %4 = tpu.matmul %1, %3, %cst {dimension_numbers = #tpu.dot_dimension_numbers<[1], [0], [0], [1], [0, 0, 1, 1], [], []>} : vector<240x128xbf16>, vector<128x128xbf16>, vector<240x128xf32> -> vector<240x128xf32>
    %c0_5 = arith.constant 0 : index
    %c0_6 = arith.constant 0 : index
    %5 = vector.load %arg3[%c0_5, %c0_6] : memref<1x128xf32, #tpu.memory_space<vmem>>, vector<1x128xf32>
    %6 = vector.broadcast %5 : vector<1x128xf32> to vector<240x128xf32>
    %7 = arith.addf %4, %6 : vector<240x128xf32>
    %cst_7 = arith.constant 0.000000e+00 : f32
    %8 = vector.broadcast %cst_7 : f32 to vector<240x128xf32>
    %9 = arith.maximumf %7, %8 : vector<240x128xf32>
    %10 = vector.shape_cast %9 : vector<240x128xf32> to vector<15x16x128xf32>
    %c0_8 = arith.constant 0 : index
    %c0_9 = arith.constant 0 : index
    %c0_10 = arith.constant 0 : index
    %11 = vector.load %arg4[%c0_8, %c0_9, %c0_10] : memref<15x1x128xf32, #tpu.memory_space<vmem>>, vector<15x1x128xf32>
    %12 = vector.broadcast %11 : vector<15x1x128xf32> to vector<15x16x128xf32>
    %13 = arith.mulf %10, %12 : vector<15x16x128xf32>
    %cst_11 = arith.constant dense<0xFF800000> : vector<16x128xf32>
    %14 = vector.multi_reduction <maximumf>, %13, %cst_11 [0] : vector<15x16x128xf32> to vector<16x128xf32>
    %15 = arith.truncf %14 : vector<16x128xf32> to vector<16x128xbf16>
    %c0_12 = arith.constant 0 : index
    %c0_13 = arith.constant 0 : index
    %16 = vector.load %arg5[%c0_12, %c0_13] : memref<128x128xbf16, #tpu.memory_space<vmem>>, vector<128x128xbf16>
    %cst_14 = arith.constant dense<0.000000e+00> : vector<16x128xf32>
    %17 = tpu.matmul %15, %16, %cst_14 {dimension_numbers = #tpu.dot_dimension_numbers<[1], [0], [0], [1], [0, 0, 1, 1], [], []>} : vector<16x128xbf16>, vector<128x128xbf16>, vector<16x128xf32> -> vector<16x128xf32>
    %c0_15 = arith.constant 0 : index
    %c0_16 = arith.constant 0 : index
    %18 = vector.load %arg6[%c0_15, %c0_16] : memref<1x128xf32, #tpu.memory_space<vmem>>, vector<1x128xf32>
    %19 = vector.broadcast %18 : vector<1x128xf32> to vector<16x128xf32>
    %20 = arith.addf %17, %19 : vector<16x128xf32>
    %c0_17 = arith.constant 0 : index
    %c0_18 = arith.constant 0 : index
    %21 = vector.load %arg7[%c0_17, %c0_18] : memref<16x128xf32, #tpu.memory_space<vmem>>, vector<16x128xf32>
    tpu.vector_store %arg7[%c0_17, %c0_18], %20 {strides = array<i32>} : memref<16x128xf32, #tpu.memory_space<vmem>>, vector<16x128xf32>,
    return
  }
  func.func @transform_0(%arg0: i32) -> (i32, i32, i32) {
    %c0_i32 = arith.constant 0 : i32
    %c0_i32_0 = arith.constant 0 : i32
    %c0_i32_1 = arith.constant 0 : i32
    return %c0_i32, %arg0, %c0_i32_0 : i32, i32, i32
  }
  func.func @transform_1(%arg0: i32) -> (i32, i32, i32) {
    %c0_i32 = arith.constant 0 : i32
    %c0_i32_0 = arith.constant 0 : i32
    %c0_i32_1 = arith.constant 0 : i32
    %c0_i32_2 = arith.constant 0 : i32
    return %c0_i32, %c0_i32_0, %c0_i32_1 : i32, i32, i32
  }
  func.func @transform_2(%arg0: i32) -> (i32, i32) {
    %c0_i32 = arith.constant 0 : i32
    %c0_i32_0 = arith.constant 0 : i32
    %c0_i32_1 = arith.constant 0 : i32
    return %c0_i32, %c0_i32_0 : i32, i32
  }
  func.func @transform_3(%arg0: i32) -> (i32, i32, i32) {
    %c0_i32 = arith.constant 0 : i32
    %c0_i32_0 = arith.constant 0 : i32
    %c0_i32_1 = arith.constant 0 : i32
    %c0_i32_2 = arith.constant 0 : i32
    return %c0_i32, %c0_i32_0, %c0_i32_1 : i32, i32, i32
  }
  func.func @transform_4(%arg0: i32) -> (i32, i32) {
    %c0_i32 = arith.constant 0 : i32
    %c0_i32_0 = arith.constant 0 : i32
    %c0_i32_1 = arith.constant 0 : i32
    return %c0_i32, %c0_i32_0 : i32, i32
  }
  func.func @transform_5(%arg0: i32) -> (i32, i32) {
    %c0_i32 = arith.constant 0 : i32
    %c0_i32_0 = arith.constant 0 : i32
    %c0_i32_1 = arith.constant 0 : i32
    return %c0_i32, %c0_i32_0 : i32, i32
  }
  func.func @transform_6(%arg0: i32) -> (i32, i32) {
    %c0_i32 = arith.constant 0 : i32
    %c0_i32_0 = arith.constant 0 : i32
    return %arg0, %c0_i32 : i32, i32
  }
}

</mosaic_0001>

<bundles_post_ra>
// kernel: tpu_custom_call.1
= control target key start
LH: loop header
LB: loop body
LE: loop exit
PB: predicated region body
PF: predicated region fallthrough
CT: control target
= control target key end

     0   :  { %s2056_s0 = inlined_call_operand.hbm [shape: bf16[15,32,128], index: 0, kind: input, shape index: {}]   ;;  %s2057_s1 = inlined_call_operand.hbm [shape: bf16[1,128,128], index: 1, kind: input, shape index: {}]   ;;  %s2058_s2 = inlined_call_operand.vmem [shape: f32[1,128], index: 2, kind: input, shape index: {}]   ;;  %s2059_s3 = inlined_call_operand.hbm [shape: f32[15,1,128], index: 3, kind: input, shape index: {}]   ;;  %s2060_s4 = inlined_call_operand.hbm [shape: bf16[128,128], index: 4, kind: input, shape index: {}]   ;;  %s2061_s5 = inlined_call_operand.vmem [shape: f32[1,128], index: 5, kind: input, shape index: {}]   ;;  %s2062_s6 = inlined_call_operand.hbm [shape: f32[32,128], index: 6, kind: output, shape index: {}]  }
   0x1   :  { %2073 = sst [smem:[#allocation21_spill]] %s2057_s1 }
   0x2   :  { %11 = vsyncpa [#allocation3], 0 }
   0x3   :  { %13 = vsyncpa [#allocation3 + $0x1], 0 }
   0x4   :  { %14 = vsyncpa [#allocation6], 0 }
   0x5   :  { %15 = vsyncpa [#allocation9], 0 }
   0x6   :  { %16 = vsyncpa [#allocation4], 0 }
   0x7   :  { %18 = vsyncpa [#allocation4 + $0x1], 0  ;;  %s1663_s21 = smov 0   ;;  %s1665_s22 = smov 0  }
   0x8   :  { %s1667_s23 = smov 0   ;;  %s1669_s24 = smov 0  }
   0x9 LB: > { %s1684_s25 = sadd.s32 4294967295, %s1608_s24   ;;  %s1110_s26 = sadd.s32 4294967294, %s1608_s24   ;;  %s1608_s24 = sphi %s1669_s24, %s2097_s24   ;;  %s1604_s23 = sphi %s1667_s23, %s2101_s23   ;;  %s1600_s22 = sphi %s1665_s22, %s2100_s22   ;;  %s1596_s21 = sphi %s1663_s21, %s2099_s21  }
   0xa   : > { %s1688_s27 = sadd.s32 1, %s1608_s24   ;;  %s31_s28 = sadd.s32 1, %s1604_s23 }
   0xb   : > { %2074 = sst [smem:[#allocation18_spill]] %s1688_s27  ;;  %s28_s29 = ssub.s32 %s1608_s24, %s1688_s27 }
   0xc   : > { %p38_p0 = scmp.ne.s32.totalorder %s1604_s23, %s1600_s22  ;;  %p29_p1 = scmp.eq.s32.totalorder %s28_s29, 0 }
   0xd   : > { %p39_p2 = scmp.eq.s32.totalorder %s1608_s24, 0  ;;  %p44_p3 = scmp.ne.s32.totalorder %s1600_s22, %s1596_s21 }
   0xe   : > { %p2063_p4 = scmp.eq.s32.totalorder %s1684_s25, 0  ;;  %p173_p7 = scmp.eq.s32.totalorder %s1684_s25, 1 }
   0xf   : > { %s1700_s30 = scalar_select %p29_p1, %s1604_s23, %s31_s28  }
  0x10   : > { %p1702_p5 = por %p39_p2, %p38_p0  ;;  %p1708_p6 = por %p2063_p4, %p44_p3 }
  0x11   : > { %2075 = sst [smem:[#allocation19_spill]] %s1700_s30  ;;  %p179_p8 = scmp.eq.s32.totalorder %s1110_s26, 1 }
  0x12   : > { %s2076_s7 = scalar_select %p1702_p5, 1, 0 }
  0x13   : > { %s2077_s8 = scalar_select %p1708_p6, 1, 0 }
  0x14   : > { %p1111_p9 = scmp.ge.s32.totalorder %s1608_s24, 1  ;;  %p186_p10 = scmp.lt.s32.totalorder %s1608_s24, 3 }
  0x15   : > { %p1715_p11 = por %p173_p7, %p38_p0  ;;  %p1719_p12 = por %p179_p8, %p44_p3 }
  0x16   : > { %p1723_p13 = pnand %p1111_p9, %p186_p10  ;;  %s1610_s12 = smov [#allocation5]  }
  0x17   : > { %s2078_s9 = scalar_select %p1715_p11, 1, 0 }
  0x18   : > { %s2079_s10 = scalar_select %p1719_p12, 1, 0 }
  0x19   : > { %s2081_s11 = scalar_select %p1723_p13, 1, 0 }
  0x1a   : > { %2080 = sst [smem:[#allocation20_spill]] %s2079_s10  ;;  %p1349_p1 = pneg %p1723_p13 }
  0x1b   : > { %s198_s13 = sshll.u32 %s1610_s12, 4  ;;  %s1611_s15 = smov [#allocation7]   ;;  %s199_s13 = int_to_ptr.vmem [resolvable:$true] %s198_s13 }
  0x1c   : > { %p1731_p2 = pnand %p1349_p1, %p2063_p4  ;;  %s214_s16 = sshll.u32 %s1611_s15, 4  ;;  %s1735_s16 = int_to_ptr.vmem [resolvable:$true] %s214_s16 }
  0x1d   : > { %s2083_s1 = sld [smem:[#allocation21_spill]] }
  0x1e   : > { %p1745_p3 = pneg %p1731_p2 }
  0x23   : > { %s1450_s19 = scalar_lea.hbm %s2083_s1, 1024 }
  0x24   : > { %p1451_p0 = scmp.ne.s32.totalorder %s2083_s1, %s1450_s19  ;;  %p1457_p9 = scmp.lt.u32.totalorder %s1450_s19, %s2083_s1 }
  0x26   : > { %p1453_p7 = pnand %p1745_p3, %p1451_p0 }
  0x28   : > { %p1454_p8 = pneg %p1453_p7 }
  0x2a   : > { %p1459_p10 = pnand %p1457_p9, %p1454_p8 }
  0x2c   : > { %1462 = shalt.err (!%p1459_p10)
}
  0x2d   : > { %s1463_s15 = scalar_lea.vmem %s199_s13, 1024  ;;  %p1471_p11 = scmp.lt.s32.totalorder %s199_s13, %s199_s13 }
  0x2e   : > { %p1464_p1 = scmp.ne.s32.totalorder %s199_s13, %s1463_s15  ;;  %p1472_p6 = scmp.lt.s32.totalorder %s1463_s15, %s1463_s15 }
  0x30   : > { %p1466_p4 = pnand %p1464_p1, %p1745_p3  ;;  %p1473_p13 = por %p1472_p6, %p1471_p11 }
  0x32   : > { %p1467_p12 = pneg %p1466_p4 }
  0x34   : > { %p1474_p5 = pnand %p1473_p13, %p1467_p12 }
  0x36   : > { %1477 = shalt.err (!%p1474_p5)
}
  0x37   : > { %s2071_s17 = smov 64   ;;  %s2072_s18 = smov 4  }
  0x38   : > { %1352 = dma.hbm_to_vmem [thread:$0]  (!%p1731_p2), %s2083_s1, 1024, %s199_s13, [#allocation6], %s2071_s17, %s2071_s17, %s2072_s18  }
  0x39   : > { %s1478_s12 = scalar_lea.hbm %s2059_s3, 240 }
  0x3a   : > { %p1479_p4 = scmp.ne.s32.totalorder %s2059_s3, %s1478_s12  ;;  %p1485_p11 = scmp.lt.u32.totalorder %s1478_s12, %s2059_s3 }
  0x3c   : > { %p1481_p5 = pnand %p1479_p4, %p1745_p3 }
  0x3e   : > { %p1482_p6 = pneg %p1481_p5 }
  0x40   : > { %p1487_p12 = pnand %p1485_p11, %p1482_p6 }
  0x42   : > { %1490 = shalt.err (!%p1487_p12)
}
  0x43   : > { %s1491_s13 = scalar_lea.vmem %s1735_s16, 240  ;;  %s1498_s30 = scalar_lea.vmem %s1735_s16, 256 }
  0x44   : > { %p1492_p13 = scmp.ne.s32.totalorder %s1735_s16, %s1491_s13  ;;  %p1499_p8 = scmp.lt.s32.totalorder %s1735_s16, %s1735_s16 }
  0x45   : > { %p1500_p9 = scmp.lt.s32.totalorder %s1498_s30, %s1491_s13 }
  0x46   : > { %p1494_p0 = pnand %p1492_p13, %p1745_p3 }
  0x47   : > { %p1501_p10 = por %p1500_p9, %p1499_p8 }
  0x48   : > { %p1495_p7 = pneg %p1494_p0 }
  0x4a   : > { %p1502_p1 = pnand %p1501_p10, %p1495_p7 }
  0x4c   : > { %1505 = shalt.err (!%p1502_p1)
}
  0x4d   : > { %s1614_s27 = smov 16   ;;  %s1615_s10 = smov 1  }
  0x4e   : > { %1355 = dma.hbm_to_vmem [thread:$0]  (!%p1731_p2), %s2059_s3, 240, %s1735_s16, [#allocation6], %s1614_s27, %s1614_s27, %s1615_s10  }
  0x4f   : > { %s1616_s26 = smov [#allocation8]   ;;  %s1506_s13 = scalar_lea.hbm %s2060_s4, 1024 }
  0x50   : > { %s227_s29 = sshll.u32 %s1616_s26, 4  ;;  %p1507_p4 = scmp.ne.s32.totalorder %s2060_s4, %s1506_s13  ;;  %s228_s29 = int_to_ptr.vmem [resolvable:$true] %s227_s29 }
  0x51   : > { %p1513_p11 = scmp.lt.u32.totalorder %s1506_s13, %s2060_s4 }
  0x52   : > { %p1509_p5 = pnand %p1507_p4, %p1745_p3 }
  0x54   : > { %p1510_p6 = pneg %p1509_p5 }
  0x56   : > { %p1515_p12 = pnand %p1513_p11, %p1510_p6 }
  0x58   : > { %1518 = shalt.err (!%p1515_p12)
}
  0x59   : > { %s1519_s16 = scalar_lea.vmem %s228_s29, 1024  ;;  %p1527_p8 = scmp.lt.s32.totalorder %s228_s29, %s228_s29 }
  0x5a   : > { %p1520_p13 = scmp.ne.s32.totalorder %s228_s29, %s1519_s16  ;;  %p1528_p9 = scmp.lt.s32.totalorder %s1519_s16, %s1519_s16 }
  0x5c   : > { %p1522_p0 = pnand %p1520_p13, %p1745_p3  ;;  %p1529_p10 = por %p1528_p9, %p1527_p8 }
  0x5e   : > { %p1523_p7 = pneg %p1522_p0 }
  0x60   : > { %p1530_p1 = pnand %p1529_p10, %p1523_p7 }
  0x62   : > { %1533 = shalt.err (!%p1530_p1)
}
  0x63   : > { %s2085_s17 = smov 4   ;;  %s2086_s27 = smov 64  }
  0x64   : > { %1358 = dma.hbm_to_vmem [thread:$0]  (!%p1731_p2), %s2060_s4, 1024, %s228_s29, [#allocation9], %s2086_s27, %s2086_s27, %s2085_s17  }
  0x65   : > { %p1115_p4 = scmp.ge.s32.totalorder %s1608_s24, 2 }
  0x67   : > { %240 = sbr.rel (%p1115_p4) target bundleno = 126 (0x7e), region = 36 }
  0x6e   : > { %s244_s14 = sand.u32 1, %s1604_s23   ;;  %s1178_s10 = sshll.u32 %s1608_s24, 7 }
  0x6f   : > { %s1324_s28 = smul.u32 120, %s244_s14  ;;  %s1617_s19 = smov 256  }
  0x70   : > { %p2087_p3 = scmp.ne.s32.totalorder %s2076_s7, 0  ;;  %s254_s12 = scalar_lea.hbm %s2056_s0, %s1178_s10 }
  0x71   : > { %s248_s13 = scalar_lea.vmem [#allocation2], %s1324_s28  ;;  %s1618_s16 = smov 128  }
  0x72   : > { %1333 = sst [smem:[#allocation12]] (%p2087_p3), %s1617_s19  ;;  %s267_s30 = sshll.u32 %s248_s13, 4  ;;  %s268_s30 = int_to_ptr.vmem [resolvable:$true] %s267_s30 }
  0x73   : > { %s1332_s20 = scalar_select %p2087_p3, [#allocation0], [#allocation13] }
  0x74   : > { %1334 = sst [smem:[#allocation12 + $0x1]] (%p2087_p3), %s1618_s16  ;;  %s1619_s17 = smov 2  }
  0x75   : > { %s259_s15 = sld [smem:[%s1332_s20]]   ;;  %s1620_s27 = smov 64  }
  0x76   : > { %1335 = sst [smem:[#allocation12 + $0x2]] (%p2087_p3), %s1619_s17  ;;  %s1621_s1 = smov 4  }
  0x77   : > { %1336 = sst [smem:[#allocation12 + $0x3]] (%p2087_p3), %s1620_s27  ;;  %s245_s28 = scalar_lea.sflag [#allocation3], %s244_s14 }
  0x78   : > { %1337 = sst [smem:[#allocation12 + $0x4]] (%p2087_p3), %s1620_s27  ;;  %s1622_s19 = smov [#allocation11]  }
  0x79   : > { %1338 = sst [smem:[#allocation12 + $0x5]] (%p2087_p3), %s1621_s1 }
  0x7b   : > { %s1118_s18 = sshll.u32 %s259_s15, 26 }
  0x7c   : > { %s1119_s10 = sadd.s32 134217728, %s1118_s18 }
  0x7d   : > { %1339 = dma.general (%p2087_p3), %s254_s12, 1920, %s268_s30, %s245_s28, %s1622_s19, [#allocation12], %s1119_s10, 0  }
  0x7e PF: > { %p2088_p2 = scmp.ne.s32.totalorder %s2081_s11, 0 }
  0x7f   : > { %s1836_s20 = sand.u32 (!%p2088_p2), 1, %s1600_s22   ;;  %p2089_p5 = scmp.ne.s32.totalorder (!%p2088_p2), %s2077_s8, 0 }
  0x80   : > { %292 = sbr.rel (%p2088_p2) target bundleno = 695 (0x2b7), region = 44  ;;  %s295_s29 = scalar_lea.sflag (!%p2088_p2), [#allocation3], %s1836_s20 }
  0x81   : > { %s1325_s26 = smul.u32 (!%p2088_p2), 120, %s1836_s20 }
  0x83   : > { %s1840_s13 = scalar_lea.vmem (!%p2088_p2), [#allocation2], %s1325_s26 }
  0x87   : > { %1579 = dma.done.wait (%p2089_p5), %s295_s29, 1920  }
  0x88   : > { %1581 = vsyncadd (%p2089_p5), %s295_s29, 4294965376  ;;  %p2090_p6 = scmp.eq.s32.totalorder %s1684_s25, 0 }
  0x8a   : > { %1583 = dma.done.wait (%p2090_p6), [#allocation6], 1264   ;;  %p2091_p11 = pmov %p2090_p6 }
  0x8b   : > { %p2092_p12 = pmov %p2090_p6 }
  0x8c   : > { %1585 = vsyncadd (%p2091_p11), [#allocation6], 4294966032 }
  0x8d   : > { %1587 = dma.done.wait (%p2092_p12), [#allocation9], 1024   ;;  %p2093_p13 = pmov %p2090_p6 }
  0x8e   : > { %v1623_v0 = vmov 0.0   ;;  %vm1624_vm0 = vmmov 0   ;;  %v1419_v1 = vld [vmem:[#allocation5] sm:$0xff]   ;;  %v1420_v2 = vld [vmem:[#allocation5 + $0x8] sm:$0xff]   ;;  %v1421_v3 = vld [vmem:[#allocation5 + $0x10] sm:$0xff]   ;;  %s1124_s11 = sshll.u32 %s1836_s20, 4 }
  0x8f   : > { %1589 = vsyncadd (%p2093_p13), [#allocation9], 4294966272  ;;  %1212 = vmatprep.subr.bf16.mxu0 %v1623_v0  ;;  %1308 = vmatprep.subr.bf16.mxu1 %v1623_v0  ;;  %v1422_v4 = vld [vmem:[#allocation5 + $0x18] sm:$0xff]   ;;  %v1423_v5 = vld [vmem:[#allocation5 + $0x20] sm:$0xff]   ;;  %s338_s15 = scalar_lea.vmem [#allocation10], %s1124_s11  ;;  %s1179_s16 = sshll.u32 %s1684_s25, 8 }
  0x90   : > { %1228 = vmatprep.mubr.msk.bf16.mxu0 %vm1624_vm0, %v1623_v0  ;;  %1260 = vmatprep.mubr.msk.bf16.mxu1 %vm1624_vm0, %v1623_v0  ;;  %v1424_v6 = vld [vmem:[#allocation5 + $0x28] sm:$0xff]   ;;  %v1425_v7 = vld [vmem:[#allocation5 + $0x30] sm:$0xff]   ;;  %v1426_v8 = vld [vmem:[#allocation5 + $0x38] sm:$0xff]   ;;  %s1008_s30 = sshll.u32 %s338_s15, 4  ;;  %s2012_s1 = scalar_lea.hbm %s2062_s6, %s1179_s16  ;;  %s2007_s30 = int_to_ptr.vmem [resolvable:$true] %s1008_s30 }
  0x91   : > { %1213 = vmatpush3.bf16.msra.mxu0 %v1419_v1  ;;  %1316 = vmatpush3.bf16.msra.mxu1 %v1419_v1  ;;  %v1427_v9 = vld [vmem:[%s1840_s13] sm:$0xff]   ;;  %v1428_v11 = vld [vmem:[%s1840_s13 + $0x8] sm:$0xff]   ;;  %v1430_v13 = vld [vmem:[%s1840_s13 + $0x10] sm:$0xff]   ;;  %s995_s18 = scalar_lea.sflag [#allocation4], %s1836_s20  ;;  %s1534_s25 = scalar_lea.vmem %s2007_s30, 256 }
  0x92   : > { %1214 = vmatprep.subr.bf16.mxu0 %v1623_v0  ;;  %1309 = vmatprep.subr.bf16.mxu1 %v1623_v0  ;;  %v1429_v10 = vld [vmem:[%s1840_s13 + $0x40] sm:$0xff]   ;;  %v1431_v12 = vld [vmem:[%s1840_s13 + $0x48] sm:$0xff]   ;;  %v1433_v14 = vld [vmem:[%s1840_s13 + $0x50] sm:$0xff]   ;;  %p1535_p0 = scmp.ne.s32.totalorder %s2007_s30, %s1534_s25  ;;  %p2094_p7 = scmp.ne.s32.totalorder %s2078_s9, 0 }
  0x93   : > { %v1432_v15 = vld [vmem:[%s1840_s13 + $0x18] sm:$0xff]   ;;  %v1434_v17 = vld [vmem:[%s1840_s13 + $0x20] sm:$0xff]   ;;  %v1436_v19 = vld [vmem:[%s1840_s13 + $0x28] sm:$0xff]   ;;  %s1625_s10 = smov [#allocation10]  }
  0x94   : > { %v1435_v16 = vld [vmem:[%s1840_s13 + $0x58] sm:$0xff]   ;;  %v1437_v18 = vld [vmem:[%s1840_s13 + $0x60] sm:$0xff]   ;;  %v1439_v20 = vld [vmem:[%s1840_s13 + $0x68] sm:$0xff]   ;;  %p1536_p8 = pnand %p1535_p0, %p2094_p7  ;;  %s1538_s28 = sshll.u32 %s1625_s10, 4  ;;  %s1539_s28 = int_to_ptr.vmem [resolvable:$false] %s1538_s28 }
  0x95   : > { %1215 = vmatpush3.bf16.msra.mxu0 %v1420_v2  ;;  %1317 = vmatpush3.bf16.msra.mxu1 %v1420_v2  ;;  %v1438_v21 = vld [vmem:[%s1840_s13 + $0x30] sm:$0xff]   ;;  %v1440_v23 = vld [vmem:[%s1840_s13 + $0x38] sm:$0xff]   ;;  %v1442_v24 = vld [vmem:[#allocation8] sm:$0xff]   ;;  %s1540_s19 = scalar_lea.vmem %s1539_s28, 512  ;;  %p1541_p10 = scmp.lt.s32.totalorder %s2007_s30, %s1539_s28 }
  0x96   : > { %1216 = vmatprep.subr.bf16.mxu0 %v1623_v0  ;;  %1310 = vmatprep.subr.bf16.mxu1 %v1623_v0  ;;  %v1441_v22 = vld [vmem:[%s1840_s13 + $0x70] sm:$0xff]   ;;  %v1445_v27 = vld [vmem:[#allocation8 + $0x18] sm:$0xff]   ;;  %v1446_v28 = vld [vmem:[#allocation8 + $0x20] sm:$0xff]   ;;  %p1537_p9 = pneg %p1536_p8  ;;  %p1542_p1 = scmp.lt.s32.totalorder %s1540_s19, %s1534_s25 }
  0x97   : > { %v1443_v25 = vld [vmem:[#allocation8 + $0x8] sm:$0xff]   ;;  %v1444_v26 = vld [vmem:[#allocation8 + $0x10] sm:$0xff]   ;;  %v1449_v31 = vld [vmem:[#allocation8 + $0x38] sm:$0xff]  }
  0x98   : > { %v1447_v29 = vld [vmem:[#allocation8 + $0x28] sm:$0xff]   ;;  %v1448_v30 = vld [vmem:[#allocation8 + $0x30] sm:$0xff]   ;;  %v1934_v44 = vld [vmem:[%s2058_s2] ss:$0 sm:$0xff]  ;;  %p1543_p3 = por %p1542_p1, %p1541_p10 }
  0x99   : > { %1217 = vmatpush3.bf16.msra.mxu0 %v1421_v3  ;;  %1318 = vmatpush3.bf16.msra.mxu1 %v1421_v3  ;;  %v1149_v57 = vld [vmem:[#allocation7] ss:$0 sm:$0xff]  ;;  %v1151_v58 = vld [vmem:[#allocation7 + $0x2] ss:$0 sm:$0xff] }
  0x9a   : > { %1218 = vmatprep.subr.bf16.mxu0 %v1623_v0  ;;  %1311 = vmatprep.subr.bf16.mxu1 %v1623_v0  ;;  %p1544_p2 = pnand %p1543_p3, %p1537_p9 }
  0x9d   : > { %1219 = vmatpush3.bf16.msra.mxu0 %v1422_v4  ;;  %1319 = vmatpush3.bf16.msra.mxu1 %v1422_v4 }
  0x9e   : > { %1220 = vmatprep.subr.bf16.mxu0 %v1623_v0  ;;  %1312 = vmatprep.subr.bf16.mxu1 %v1623_v0 }
  0xa1   : > { %1221 = vmatpush3.bf16.msra.mxu0 %v1423_v5  ;;  %1320 = vmatpush3.bf16.msra.mxu1 %v1423_v5 }
  0xa2   : > { %1222 = vmatprep.subr.bf16.mxu0 %v1623_v0  ;;  %1313 = vmatprep.subr.bf16.mxu1 %v1623_v0 }
  0xa5   : > { %1223 = vmatpush3.bf16.msra.mxu0 %v1424_v6  ;;  %1321 = vmatpush3.bf16.msra.mxu1 %v1424_v6 }
  0xa6   : > { %1224 = vmatprep.subr.bf16.mxu0 %v1623_v0  ;;  %1314 = vmatprep.subr.bf16.mxu1 %v1623_v0 }
  0xa9   : > { %1225 = vmatpush3.bf16.msra.mxu0 %v1425_v7  ;;  %1322 = vmatpush3.bf16.msra.mxu1 %v1425_v7 }
  0xaa   : > { %1226 = vmatprep.subr.bf16.mxu0 %v1623_v0  ;;  %1315 = vmatprep.subr.bf16.mxu1 %v1623_v0 }
  0xad   : > { %1227 = vmatpush3.bf16.msra.mxu0 %v1426_v8  ;;  %1323 = vmatpush3.bf16.msra.mxu1 %v1426_v8 }
  0xae   : > { %1288 = vmatprep.subr.bf16.mxu1 %v1623_v0 }
  0xb0   : > { %1229 = vmatmul.mubr.bf16.vlgmr.msra.gmra.mrb[0].mxu0 %v1427_v9  ;;  %1261 = vmatmul.mubr.bf16.vlgmr.msra.gmra.mrb[0].mxu1 %v1429_v10 }
  0xb1   : > { %1232 = vmatprep.mubr.msk.bf16.mxu0 %vm1624_vm0, %v1623_v0  ;;  %1264 = vmatprep.mubr.msk.bf16.mxu1 %vm1624_vm0, %v1623_v0 }
  0xb2   : > { %1289 = vmatpush3.bf16.msra.mxu1 %v1442_v24 }
  0xb3   : > { %1290 = vmatprep.subr.bf16.mxu1 %v1623_v0 }
  0xb6   : > { %1291 = vmatpush3.bf16.msra.mxu1 %v1443_v25 }
  0xb7   : > { %1292 = vmatprep.subr.bf16.mxu1 %v1623_v0 }
  0xb8   : > { %1233 = vmatmul.mubr.bf16.gmra.mrb[4].mxu0 %v1428_v11  ;;  %1265 = vmatmul.mubr.bf16.gmra.mrb[4].mxu1 %v1431_v12 }
  0xb9   : > { %1236 = vmatprep.mubr.msk.bf16.mxu0 %vm1624_vm0, %v1623_v0  ;;  %1268 = vmatprep.mubr.msk.bf16.mxu1 %vm1624_vm0, %v1623_v0 }
  0xba   : > { %1293 = vmatpush3.bf16.msra.mxu1 %v1444_v26 }
  0xbb   : > { %1294 = vmatprep.subr.bf16.mxu1 %v1623_v0 }
  0xbe   : > { %1295 = vmatpush3.bf16.msra.mxu1 %v1445_v27 }
  0xbf   : > { %1296 = vmatprep.subr.bf16.mxu1 %v1623_v0 }
  0xc0   : > { %1237 = vmatmul.mubr.bf16.gmra.mrb[8].mxu0 %v1430_v13  ;;  %1269 = vmatmul.mubr.bf16.gmra.mrb[8].mxu1 %v1433_v14 }
  0xc1   : > { %1240 = vmatprep.mubr.msk.bf16.mxu0 %vm1624_vm0, %v1623_v0  ;;  %1272 = vmatprep.mubr.msk.bf16.mxu1 %vm1624_vm0, %v1623_v0 }
  0xc2   : > { %1297 = vmatpush3.bf16.msra.mxu1 %v1446_v28 }
  0xc3   : > { %1298 = vmatprep.subr.bf16.mxu1 %v1623_v0 }
  0xc6   : > { %1299 = vmatpush3.bf16.msra.mxu1 %v1447_v29 }
  0xc7   : > { %1300 = vmatprep.subr.bf16.mxu1 %v1623_v0 }
  0xc8   : > { %1241 = vmatmul.mubr.bf16.gmra.mrb[12].mxu0 %v1432_v15  ;;  %1273 = vmatmul.mubr.bf16.gmra.mrb[12].mxu1 %v1435_v16 }
  0xc9   : > { %1244 = vmatprep.mubr.msk.bf16.mxu0 %vm1624_vm0, %v1623_v0  ;;  %1276 = vmatprep.mubr.msk.bf16.mxu1 %vm1624_vm0, %v1623_v0 }
  0xca   : > { %1301 = vmatpush3.bf16.msra.mxu1 %v1448_v30 }
  0xcb   : > { %1302 = vmatprep.subr.bf16.mxu1 %v1623_v0 }
  0xce   : > { %1303 = vmatpush3.bf16.msra.mxu1 %v1449_v31 }
  0xd0   : > { %1245 = vmatmul.mubr.bf16.gmra.mrb[16].mxu0 %v1434_v17  ;;  %1277 = vmatmul.mubr.bf16.gmra.mrb[16].mxu1 %v1437_v18  ;;  %v1150_v17 = vld [vmem:[#allocation7 + $0x1] ss:$0 sm:$0xff]  ;;  %v1152_v18 = vld [vmem:[#allocation7 + $0x3] ss:$0 sm:$0xff] }
  0xd1   : > { %1248 = vmatprep.mubr.msk.bf16.mxu0 %vm1624_vm0, %v1623_v0  ;;  %1280 = vmatprep.mubr.msk.bf16.mxu1 %vm1624_vm0, %v1623_v0 }
  0xd8   : > { %1249 = vmatmul.mubr.bf16.gmra.mrb[20].mxu0 %v1436_v19  ;;  %1281 = vmatmul.mubr.bf16.gmra.mrb[20].mxu1 %v1439_v20 }
  0xd9   : > { %1252 = vmatprep.mubr.msk.bf16.mxu0 %vm1624_vm0, %v1623_v0  ;;  %1284 = vmatprep.mubr.msk.bf16.mxu1 %vm1624_vm0, %v1623_v0 }
  0xe0   : > { %1253 = vmatmul.mubr.bf16.gmra.mrb[24].mxu0 %v1438_v21  ;;  %1285 = vmatmul.mubr.bf16.gmra.mrb[24].mxu1 %v1441_v22 }
  0xe1   : > { %1256 = vmatprep.mubr.msk.bf16.mxu0 %vm1624_vm0, %v1623_v0  ;;  %1304 = vmatprep.mubr.msk.bf16.mxu1 %vm1624_vm0, %v1623_v0 }
  0xe8   : > { %1257 = vmatmul.mubr.bf16.gmra.mrb[28].mxu0 %v1440_v23 }
 0x183   : > { %v567_v32 = vpop.f32.mrb[0].mxu0  ;;  %v1925_v33 = vpop.f32.mrb[0].mxu1 }
 0x184   : > { %v1230_v34 = vpop.f32.mrb[1].mxu0  ;;  %v1262_v35 = vpop.f32.mrb[1].mxu1  ;;  %v568_v49 = vadd.f32 %v1934_v44, %v567_v32 }
 0x185   : > { %v570_v36 = vpop.f32.mrb[2].mxu0  ;;  %v1927_v37 = vpop.f32.mrb[2].mxu1 }
 0x186   : > { %v1231_v38 = vpop.f32.mrb[3].mxu0  ;;  %v1263_v39 = vpop.f32.mrb[3].mxu1  ;;  %v571_v50 = vadd.f32 %v1934_v44, %v570_v36  ;;  %v686_v53 = vmax.f32 %v568_v49, 0.0 }
 0x188   : > { %v687_v61 = vmax.f32 %v571_v50, 0.0  ;;  %v821_v2 = vmul.f32 %v1149_v57, %v686_v53 }
 0x18a   : > { %v822_v6 = vmul.f32 %v1149_v57, %v687_v61 }
 0x18b   : > { %v575_v40 = vpop.f32.mrb[4].mxu0  ;;  %v1929_v41 = vpop.f32.mrb[4].mxu1 }
 0x18c   : > { %v1234_v42 = vpop.f32.mrb[5].mxu0  ;;  %v1266_v43 = vpop.f32.mrb[5].mxu1  ;;  %v576_v3 = vadd.f32 %v1934_v44, %v575_v40  ;;  %v1153_v40 = vld [vmem:[#allocation7 + $0x4] ss:$0 sm:$0xff] }
 0x18d   : > { %v578_v45 = vpop.f32.mrb[6].mxu0  ;;  %v1936_v46 = vpop.f32.mrb[6].mxu1 }
 0x18e   : > { %v1235_v47 = vpop.f32.mrb[7].mxu0  ;;  %v1267_v48 = vpop.f32.mrb[7].mxu1  ;;  %v579_v7 = vadd.f32 %v1934_v44, %v578_v45  ;;  %v688_v12 = vmax.f32 %v576_v3, 0.0 }
 0x190   : > { %v689_v21 = vmax.f32 %v579_v7, 0.0  ;;  %v823_v26 = vmul.f32 %v1150_v17, %v688_v12  ;;  %v632_v7 = vadd.f32 %v1934_v44, %v1925_v33 }
 0x192   : > { %v824_v29 = vmul.f32 %v1150_v17, %v689_v21 }
 0x193   : > { %v583_v51 = vpop.f32.mrb[8].mxu0  ;;  %v1940_v52 = vpop.f32.mrb[8].mxu1 }
 0x194   : > { %v584_v54 = vadd.f32 %v1934_v44, %v583_v51  ;;  %v1238_v55 = vpop.f32.mrb[9].mxu0  ;;  %v1270_v56 = vpop.f32.mrb[9].mxu1  ;;  %v648_v12 = vadd.f32 %v1934_v44, %v1940_v52 }
 0x195   : > { %v586_v59 = vpop.f32.mrb[10].mxu0  ;;  %v1943_v60 = vpop.f32.mrb[10].mxu1 }
 0x196   : > { %v690_v62 = vmax.f32 %v584_v54, 0.0  ;;  %v587_v63 = vadd.f32 %v1934_v44, %v586_v59  ;;  %v1239_v0 = vpop.f32.mrb[11].mxu0  ;;  %v1271_v1 = vpop.f32.mrb[11].mxu1 }
 0x198   : > { %v825_v4 = vmul.f32 %v1151_v58, %v690_v62  ;;  %v691_v5 = vmax.f32 %v587_v63, 0.0  ;;  %v1154_v62 = vld [vmem:[#allocation7 + $0x5] ss:$0 sm:$0xff] }
 0x19a   : > { %v851_v8 = vmax.f32 %v821_v2, %v825_v4  ;;  %v826_v9 = vmul.f32 %v1151_v58, %v691_v5 }
 0x19b   : > { %v591_v10 = vpop.f32.mrb[12].mxu0  ;;  %v1948_v11 = vpop.f32.mrb[12].mxu1 }
 0x19c   : > { %v865_v13 = vmax.f32 %v822_v6, %v826_v9  ;;  %v592_v14 = vadd.f32 %v1934_v44, %v591_v10  ;;  %v1242_v15 = vpop.f32.mrb[13].mxu0  ;;  %v1274_v16 = vpop.f32.mrb[13].mxu1 }
 0x19d   : > { %v594_v19 = vpop.f32.mrb[14].mxu0  ;;  %v1951_v20 = vpop.f32.mrb[14].mxu1  ;;  %v651_v15 = vadd.f32 %v1934_v44, %v1943_v60  ;;  %v643_v60 = vadd.f32 %v1934_v44, %v1936_v46 }
 0x19e   : > { %v692_v22 = vmax.f32 %v592_v14, 0.0  ;;  %v595_v23 = vadd.f32 %v1934_v44, %v594_v19  ;;  %v1243_v24 = vpop.f32.mrb[15].mxu0  ;;  %v1275_v25 = vpop.f32.mrb[15].mxu1  ;;  %v702_v19 = vmax.f32 %v632_v7, 0.0  ;;  %v1158_v7 = vld [vmem:[#allocation7 + $0x9] ss:$0 sm:$0xff] }
 0x19f   : > { %v1157_v25 = vld [vmem:[#allocation7 + $0x8] ss:$0 sm:$0xff]  ;;  %v705_v46 = vmax.f32 %v643_v60, 0.0 }
 0x1a0   : > { %v827_v27 = vmul.f32 %v1152_v18, %v692_v22  ;;  %v693_v28 = vmax.f32 %v595_v23, 0.0  ;;  %v1155_v22 = vld [vmem:[#allocation7 + $0x6] ss:$0 sm:$0xff] }
 0x1a1   : > { %v840_v60 = vmul.f32 %v1158_v7, %v705_v46 }
 0x1a2   : > { %v852_v30 = vmax.f32 %v823_v26, %v827_v27  ;;  %v828_v31 = vmul.f32 %v1152_v18, %v693_v28  ;;  %v640_v26 = vadd.f32 %v1934_v44, %v1929_v41 }
 0x1a3   : > { %v599_v32 = vpop.f32.mrb[16].mxu0  ;;  %v663_v34 = vpop.f32.mrb[16].mxu1 }
 0x1a4   : > { %v866_v35 = vmax.f32 %v824_v29, %v828_v31  ;;  %v600_v36 = vadd.f32 %v1934_v44, %v599_v32  ;;  %v1246_v38 = vpop.f32.mrb[17].mxu0  ;;  %v1278_v39 = vpop.f32.mrb[17].mxu1  ;;  %v706_v31 = vmax.f32 %v648_v12, 0.0 }
 0x1a5   : > { %v602_v42 = vpop.f32.mrb[18].mxu0  ;;  %v666_v43 = vpop.f32.mrb[18].mxu1 }
 0x1a6   : > { %v694_v45 = vmax.f32 %v600_v36, 0.0  ;;  %v603_v47 = vadd.f32 %v1934_v44, %v602_v42  ;;  %v1247_v48 = vpop.f32.mrb[19].mxu0  ;;  %v1279_v49 = vpop.f32.mrb[19].mxu1  ;;  %v667_v32 = vadd.f32 %v1934_v44, %v666_v43  ;;  %v707_v36 = vmax.f32 %v651_v15, 0.0 }
 0x1a7   : > { %v1161_v48 = vld [vmem:[#allocation7 + $0xc] ss:$0 sm:$0xff]  ;;  %v656_v43 = vadd.f32 %v1934_v44, %v1948_v11 }
 0x1a8   : > { %v829_v50 = vmul.f32 %v1153_v40, %v694_v45  ;;  %v695_v51 = vmax.f32 %v603_v47, 0.0  ;;  %v704_v47 = vmax.f32 %v640_v26, 0.0 }
 0x1aa   : > { %v1956_v53 = vmax.f32 %v851_v8, %v829_v50  ;;  %v830_v54 = vmul.f32 %v1153_v40, %v695_v51  ;;  %v635_v8 = vadd.f32 %v1934_v44, %v1927_v37  ;;  %v664_v37 = vadd.f32 %v1934_v44, %v663_v34  ;;  %v1163_v51 = vld [vmem:[#allocation7 + $0xe] ss:$0 sm:$0xff] }
 0x1ab   : > { %v607_v55 = vpop.f32.mrb[20].mxu0  ;;  %v1958_v56 = vpop.f32.mrb[20].mxu1  ;;  %v837_v40 = vmul.f32 %v1157_v25, %v702_v19 }
 0x1ac   : > { %v1960_v57 = vmax.f32 %v865_v13, %v830_v54  ;;  %v608_v58 = vadd.f32 %v1934_v44, %v607_v55  ;;  %v1250_v59 = vpop.f32.mrb[21].mxu0  ;;  %v1282_v61 = vpop.f32.mrb[21].mxu1  ;;  %v703_v21 = vmax.f32 %v635_v8, 0.0  ;;  %v710_v41 = vmax.f32 %v664_v37, 0.0 }
 0x1ad   : > { %v610_v63 = vpop.f32.mrb[22].mxu0  ;;  %v1963_v0 = vpop.f32.mrb[22].mxu1  ;;  %v711_v55 = vmax.f32 %v667_v32, 0.0  ;;  %v839_v37 = vmul.f32 %v1158_v7, %v704_v47 }
 0x1ae   : > { %v696_v1 = vmax.f32 %v608_v58, 0.0  ;;  %v611_v2 = vadd.f32 %v1934_v44, %v610_v63  ;;  %v1251_v3 = vpop.f32.mrb[23].mxu0  ;;  %v1283_v4 = vpop.f32.mrb[23].mxu1  ;;  %v838_v42 = vmul.f32 %v1157_v25, %v703_v21 }
 0x1af   : > { %v659_v3 = vadd.f32 %v1934_v44, %v1951_v20  ;;  %v672_v4 = vadd.f32 %v1934_v44, %v1958_v56  ;;  %v846_v15 = vmul.f32 %v1161_v48, %v711_v55 }
 0x1b0   : > { %v831_v5 = vmul.f32 %v1154_v62, %v696_v1  ;;  %v697_v6 = vmax.f32 %v611_v2, 0.0 }
 0x1b2   : > { %v1970_v9 = vmax.f32 %v852_v30, %v831_v5  ;;  %v832_v10 = vmul.f32 %v1154_v62, %v697_v6  ;;  %v1156_v5 = vld [vmem:[#allocation7 + $0x7] ss:$0 sm:$0xff] }
 0x1b3   : > { %v615_v13 = vpop.f32.mrb[24].mxu0  ;;  %v679_v14 = vpop.f32.mrb[24].mxu1 }
 0x1b4   : > { %v1976_v16 = vmax.f32 %v866_v35, %v832_v10  ;;  %v616_v17 = vadd.f32 %v1934_v44, %v615_v13  ;;  %v1254_v18 = vpop.f32.mrb[25].mxu0  ;;  %v1286_v33 = vpop.f32.mrb[25].mxu1  ;;  %v680_v24 = vadd.f32 %v1934_v44, %v679_v14  ;;  %v1159_v35 = vld [vmem:[#allocation7 + $0xa] ss:$0 sm:$0xff]  ;;  %v708_v14 = vmax.f32 %v656_v43, 0.0 }
 0x1b5   : > { %v618_v23 = vpop.f32.mrb[26].mxu0  ;;  %v682_v52 = vpop.f32.mrb[26].mxu1  ;;  %v841_v54 = vmul.f32 %v1159_v35, %v706_v31  ;;  %v842_v61 = vmul.f32 %v1159_v35, %v707_v36  ;;  %v1160_v18 = vld [vmem:[#allocation7 + $0xb] ss:$0 sm:$0xff] }
 0x1b6   : > { %v698_v27 = vmax.f32 %v616_v17, 0.0  ;;  %v619_v28 = vadd.f32 %v1934_v44, %v618_v23  ;;  %v1255_v29 = vpop.f32.mrb[27].mxu0  ;;  %v1287_v30 = vpop.f32.mrb[27].mxu1  ;;  %v683_v34 = vadd.f32 %v1934_v44, %v682_v52  ;;  %v714_v45 = vmax.f32 %v680_v24, 0.0 }
 0x1b7   : > { %v675_v17 = vadd.f32 %v1934_v44, %v1963_v0  ;;  %v712_v23 = vmax.f32 %v672_v4, 0.0 }
 0x1b8   : > { %v833_v38 = vmul.f32 %v1155_v22, %v698_v27  ;;  %v699_v39 = vmax.f32 %v619_v28, 0.0  ;;  %v715_v59 = vmax.f32 %v683_v34, 0.0  ;;  %v849_v6 = vmul.f32 %v1163_v51, %v714_v45  ;;  %v1162_v28 = vld [vmem:[#allocation7 + $0xd] ss:$0 sm:$0xff] }
 0x1b9   : > { %v843_v27 = vmul.f32 %v1160_v18, %v708_v14  ;;  %v713_v29 = vmax.f32 %v675_v17, 0.0  ;;  %v847_v32 = vmul.f32 %v1162_v28, %v712_v23 }
 0x1ba   : > { %v855_v49 = vmax.f32 %v1956_v53, %v833_v38  ;;  %v834_v50 = vmul.f32 %v1155_v22, %v699_v39  ;;  %v845_v53 = vmul.f32 %v1161_v48, %v710_v41  ;;  %v850_v20 = vmul.f32 %v1163_v51, %v715_v59 }
 0x1bb   : > { %v623_v58 = vpop.f32.mrb[28].mxu0  ;;  %v709_v22 = vmax.f32 %v659_v3, 0.0  ;;  %v848_v36 = vmul.f32 %v1162_v28, %v713_v29 }
 0x1bc   : > { %v857_v62 = vmax.f32 %v855_v49, %v837_v40  ;;  %v869_v63 = vmax.f32 %v1960_v57, %v834_v50  ;;  %v624_v1 = vadd.f32 %v1934_v44, %v623_v58  ;;  %v1258_v2 = vpop.f32.mrb[29].mxu0 }
 0x1bd   : > { %v626_v11 = vpop.f32.mrb[30].mxu0  ;;  %v844_v31 = vmul.f32 %v1160_v18, %v709_v22 }
 0x1be   : > { %v871_v8 = vmax.f32 %v869_v63, %v838_v42  ;;  %v700_v10 = vmax.f32 %v624_v1, 0.0  ;;  %v859_v12 = vmax.f32 %v857_v62, %v841_v54  ;;  %v627_v13 = vadd.f32 %v1934_v44, %v626_v11  ;;  %v1259_v57 = vpop.f32.mrb[31].mxu0 }
 0x1c0   : > { %v835_v33 = vmul.f32 %v1156_v5, %v700_v10  ;;  %v861_v19 = vmax.f32 %v859_v12, %v845_v53  ;;  %v701_v56 = vmax.f32 %v627_v13, 0.0  ;;  %v873_v21 = vmax.f32 %v871_v8, %v842_v61 }
 0x1c2   : > { %v856_v24 = vmax.f32 %v1970_v9, %v835_v33  ;;  %v863_v52 = vmax.f32 %v861_v19, %v849_v6  ;;  %v836_v25 = vmul.f32 %v1156_v5, %v701_v56  ;;  %v875_v26 = vmax.f32 %v873_v21, %v846_v15 }
 0x1c4   : > { %v858_v44 = vmax.f32 %v856_v24, %v839_v37  ;;  %v870_v0 = vmax.f32 %v1976_v16, %v836_v25  ;;  %v877_v30 = vmax.f32 %v875_v26, %v850_v20  ;;  %v1164_v16 = vld [vmem:[%s2061_s5] ss:$0 sm:$0xff] }
 0x1c6   : > { %v860_v34 = vmax.f32 %v858_v44, %v843_v27  ;;  %v872_v35 = vmax.f32 %v870_v0, %v840_v60 }
 0x1c8   : > { %v862_v38 = vmax.f32 %v860_v34, %v847_v32  ;;  %v874_v9 = vmax.f32 %v872_v35, %v844_v31 }
 0x1ca   : > { %v864_v39 = vmax.f32 %v863_v52, %v862_v38  ;;  %v876_v40 = vmax.f32 %v874_v9, %v848_v36 }
 0x1cc   : > { %v878_v42 = vmax.f32 %v877_v30, %v876_v40 }
 0x1ce   : > { %v879_v41 = vpack.c.bf16 %v878_v42, %v864_v39 }
 0x1d0   : > { %1305 = vmatmul.mubr.bf16.vlgmr.msra.gmra.mrb[28].mxu1 %v879_v41 }
 0x2a3   : > { %v985_v45 = vpop.f32.mrb[28].mxu1 }
 0x2a4   : > { %v986_v47 = vadd.f32 %v1164_v16, %v985_v45  ;;  %v1306_v46 = vpop.f32.mrb[29].mxu1 }
 0x2a5   : > { %v988_v48 = vpop.f32.mrb[30].mxu1 }
 0x2a6   : > { %992 = vst [vmem:[%s338_s15] sm:$0xff] %v986_v47  ;;  %v989_v49 = vadd.f32 %v1164_v16, %v988_v48  ;;  %v1307_v50 = vpop.f32.mrb[31].mxu1 }
 0x2a8   : > { %993 = vst [vmem:[%s338_s15 + $0x8] sm:$0xff] %v989_v49 }
 0x2a9   : > { %1547 = shalt.err (!%p1544_p2)
}
 0x2aa   : > { %s1548_s26 = scalar_lea.hbm %s2012_s1, 256  ;;  %s1552_s7 = scalar_lea.hbm %s2062_s6, 512 }
 0x2ab   : > { %p1549_p5 = scmp.ne.s32.totalorder %s2012_s1, %s1548_s26  ;;  %p1553_p12 = scmp.lt.u32.totalorder %s2012_s1, %s2062_s6 }
 0x2ac   : > { %p1554_p13 = scmp.lt.u32.totalorder %s1552_s7, %s1548_s26  ;;  %p1556_p8 = scmp.lt.u32.totalorder %s1548_s26, %s2012_s1 }
 0x2ad   : > { %p1550_p6 = pnand %p1549_p5, %p2094_p7 }
 0x2ae   : > { %p1555_p0 = por %p1554_p13, %p1553_p12 }
 0x2af   : > { %p1551_p11 = pneg %p1550_p6 }
 0x2b0   : > { %p1557_p9 = por %p1556_p8, %p1555_p0 }
 0x2b2   : > { %p1558_p10 = pnand %p1557_p9, %p1551_p11 }
 0x2b4   : > { %1561 = shalt.err (!%p1558_p10)
}
 0x2b5   : > { %s1626_s14 = smov 128   ;;  %s1627_s12 = smov 8  }
 0x2b6   : > { %1347 = dma.vmem_to_hbm [thread:$0]  (%p2094_p7), %s2007_s30, 256, %s2012_s1, %s995_s18, %s1626_s14, %s1626_s14, %s1627_s12  }
 0x2b7 PF: > { %s2095_s15 = sld [smem:[#allocation20_spill]]  ;;  %s1023_s16 = sand.u32 1, %s1596_s21  }
 0x2b8   : > { %s1024_s17 = scalar_lea.sflag [#allocation4], %s1023_s16 }
 0x2bd   : > { %p2096_p1 = scmp.ne.s32.totalorder %s2095_s15, 0 }
 0x2bf   : > { %p1360_p3 = pnand %p1115_p4, %p2096_p1 }
 0x2c1   : > { %1591 = dma.done.wait (!%p1360_p3), %s1024_s17, 256  }
 0x2c2   : > { %1593 = vsyncadd (!%p1360_p3), %s1024_s17, 4294967040  ;;  %s2097_s24 = sld [smem:[#allocation18_spill]]  ;;  %s2098_s27 = sld [smem:[#allocation19_spill]] }
 0x2c3   : > { %s2099_s21 = smov %s1600_s22  ;;  %s2100_s22 = smov %s1604_s23 }
 0x2c8   : > { %p21_p2 = scmp.ge.s32.totalorder %s2097_s24, 4   ;;  %s2101_s23 = smov %s2098_s27 }
 0x2ca   :  { %23 = sbr.rel (!%p21_p2) target bundleno = 9 (0x9), region = 106 }
 0x2d1   :  { %1029 = vsyncpa [#allocation3], 1 }
 0x2d2   :  { %1031 = vsyncpa [#allocation3 + $0x1], 1 }
 0x2d3   :  { %1032 = vsyncpa [#allocation6], 1 }
 0x2d4   :  { %1033 = vsyncpa [#allocation9], 1 }
 0x2d5   :  { %1034 = vsyncpa [#allocation4], 1 }
 0x2d6   :  { %1036 = vsyncpa [#allocation4 + $0x1], 1 }

</bundles_post_ra>
